<compile_context>
chip_gen: v6e
topology: v6e:2x2x1
jax: 0.10.0
libtpu: 0.0.40
codegen_flags: <defaults>
</compile_context>

<pallas_src>
import functools

import jax
import jax.numpy as jnp
from jax.experimental import pallas as pl
from jax.experimental.pallas import tpu as pltpu


HIDDEN = 256  # matches nn.Linear(obs_dim, 256)


def _round_up(x, m):
    return (x + m - 1) // m * m


def _actor_critic_kernel(act_dim,
                         act_lim_ref,       # SMEM (1,1) f32
                         obs_ref,           # VMEM [TB, obs_dim]
                         w_trunk_ref,       # VMEM [obs_dim, 512]
                         b_all_ref,         # VMEM [1, 512 + OUTW]
                         w_head_ref,        # VMEM [512, OUTW]
                         out_ref):          # VMEM [TB, OUTW]
    act_limit = act_lim_ref[0, 0]
    x = obs_ref[...]                                   # [TB, obs_dim] f32

    b_trunk = b_all_ref[:, : 2 * HIDDEN]               # [1, 512]
    b_head = b_all_ref[:, 2 * HIDDEN:]                 # [1, OUTW]

    # ---- fused trunk: [h_v | h_p] in one MXU op, relu6 on both halves ----
    h = jnp.dot(x, w_trunk_ref[...],
                preferred_element_type=jnp.float32) + b_trunk
    h = jnp.clip(h, 0.0, 6.0)                          # F.relu6

    # ---- fused heads: block-diagonal [512, OUTW] weight -> one wide matmul ----
    lin = jnp.dot(h, w_head_ref[...],
                  preferred_element_type=jnp.float32) + b_head   # [TB, OUTW]

    # Per-column activation: col 0 -> identity (value),
    # cols 1..act_dim -> tanh * act_limit (mu),
    # cols act_dim+1..2*act_dim -> softplus (sigma), rest -> 0 (lane padding).
    col = jax.lax.broadcasted_iota(jnp.int32, lin.shape, 1)
    mu_part = jnp.tanh(lin) * act_limit
    sig_part = jnp.maximum(lin, 0.0) + jnp.log1p(jnp.exp(-jnp.abs(lin)))
    out = jnp.where(col == 0, lin,
          jnp.where(col <= act_dim, mu_part,
          jnp.where(col <= 2 * act_dim, sig_part, 0.0)))

    out_ref[...] = out                                 # single lane-dense store


def pack_params(params, act_dim):
    """Fold the 10 per-layer tensors into 3 lane-dense slabs (done once)."""
    out_w = max(128, _round_up(1 + 2 * act_dim, 128))

    # Trunk: [obs_dim, 512] = [w_v1 | w_p1]
    w_trunk = jnp.concatenate([params["w_v1"], params["w_p1"]], axis=1)

    # Heads: block-diagonal [512, out_w]; zero padding keeps columns independent.
    w_head = jnp.zeros((2 * HIDDEN, out_w), jnp.float32)
    w_head = w_head.at[:HIDDEN, 0:1].set(params["w_v2"])
    w_head = w_head.at[HIDDEN:, 1:1 + act_dim].set(params["w_mu"])
    w_head = w_head.at[HIDDEN:, 1 + act_dim:1 + 2 * act_dim].set(params["w_sig"])

    b_head = jnp.zeros((1, out_w), jnp.float32)
    b_head = b_head.at[:, 0:1].set(params["b_v2"])
    b_head = b_head.at[:, 1:1 + act_dim].set(params["b_mu"])
    b_head = b_head.at[:, 1 + act_dim:1 + 2 * act_dim].set(params["b_sig"])

    # All biases in one slab: [1, 512 + out_w]
    b_all = jnp.concatenate([params["b_v1"], params["b_p1"], b_head], axis=1)

    return dict(w_trunk=w_trunk, w_head=w_head, b_all=b_all, out_w=out_w)


def actor_critic_forward(obs, packed, act_limit, act_dim, *, tile_b=512):
    """obs: [B, obs_dim] f32. packed: from pack_params. Returns (value, mu, sigma)."""
    B, obs_dim = obs.shape
    out_w = packed["out_w"]

    # Batch tiling (pad rows so TILE_B | B_pad; padded rows are sliced off).
    tile = min(tile_b, _round_up(B, 8))
    b_pad = _round_up(B, tile)
    if b_pad != B:
        obs = jnp.pad(obs, ((0, b_pad - B), (0, 0)))
    grid = (b_pad // tile,)

    act_lim_arr = jnp.asarray(act_limit, jnp.float32).reshape(1, 1)

    out = pl.pallas_call(
        functools.partial(_actor_critic_kernel, act_dim),
        out_shape=jax.ShapeDtypeStruct((b_pad, out_w), jnp.float32),
        grid_spec=pltpu.PrefetchScalarGridSpec(
            num_scalar_prefetch=0,
            grid=grid,
            in_specs=[
                # act_limit scalar lives in SMEM (no recompile when it changes).
                pl.BlockSpec((1, 1), lambda i: (0, 0),
                             memory_space=pltpu.MemorySpace.SMEM),
                # obs tiled over batch; weights/biases VMEM-resident.
                pl.BlockSpec((tile, obs_dim), lambda i: (i, 0)),
                pl.BlockSpec((obs_dim, 2 * HIDDEN), lambda i: (0, 0)),
                pl.BlockSpec((1, 2 * HIDDEN + out_w), lambda i: (0, 0)),
                pl.BlockSpec((2 * HIDDEN, out_w), lambda i: (0, 0)),
            ],
            out_specs=pl.BlockSpec((tile, out_w), lambda i: (i, 0)),
        ),
        compiler_params=pltpu.CompilerParams(
            dimension_semantics=("parallel",)),
    )(act_lim_arr, obs, packed["w_trunk"], packed["b_all"], packed["w_head"])

    value = out[:B, 0:1]
    mu = out[:B, 1:1 + act_dim]
    sigma = out[:B, 1 + act_dim:1 + 2 * act_dim]
    return value, mu, sigma


def init_params(key, obs_dim, act_dim):
    """Deterministic init mimicking nn.Linear's U(-1/sqrt(fan_in), 1/sqrt(fan_in))."""
    def linear(k, fan_in, fan_out):
        k_w, k_b = jax.random.split(k)
        bound = 1.0 / jnp.sqrt(jnp.float32(fan_in))
        w = jax.random.uniform(k_w, (fan_in, fan_out), jnp.float32, -bound, bound)
        b = jax.random.uniform(k_b, (1, fan_out), jnp.float32, -bound, bound)
        return w, b

    keys = jax.random.split(key, 5)
    w_v1, b_v1 = linear(keys[0], obs_dim, HIDDEN)
    w_v2, b_v2 = linear(keys[1], HIDDEN, 1)
    w_p1, b_p1 = linear(keys[2], obs_dim, HIDDEN)
    w_mu, b_mu = linear(keys[3], HIDDEN, act_dim)
    w_sg, b_sg = linear(keys[4], HIDDEN, act_dim)
    return dict(w_v1=w_v1, b_v1=b_v1, w_v2=w_v2, b_v2=b_v2,
                w_p1=w_p1, b_p1=b_p1, w_mu=w_mu, b_mu=b_mu,
                w_sig=w_sg, b_sig=b_sg)


def reference_forward(obs, params, act_limit):
    """Pure-JAX reference mirroring the PyTorch forward."""
    relu6 = lambda x: jnp.clip(x, 0.0, 6.0)
    h_v = relu6(obs @ params["w_v1"] + params["b_v1"])
    value = h_v @ params["w_v2"] + params["b_v2"]
    h_p = relu6(obs @ params["w_p1"] + params["b_p1"])
    mu = jnp.tanh(h_p @ params["w_mu"] + params["b_mu"]) * act_limit
    sigma = jax.nn.softplus(h_p @ params["w_sig"] + params["b_sig"])
    return value, mu, sigma


if __name__ == "__main__":
    key = jax.random.PRNGKey(0)
    k_param, k_obs = jax.random.split(key)

    B, obs_dim, act_dim = 8, 8, 4
    act_limit = 2.0

    params = init_params(k_param, obs_dim, act_dim)
    packed = pack_params(params, act_dim)
    obs = jax.random.normal(k_obs, (B, obs_dim), jnp.float32)

    value, mu, sigma = actor_critic_forward(obs, packed, act_limit, act_dim)
    jax.block_until_ready((value, mu, sigma))

    # Sanity-check against the pure-JAX reference (f32 kernel path -> tight tol).
    v_ref, mu_ref, sg_ref = reference_forward(obs, params, act_limit)
    assert value.shape == (B, 1) and mu.shape == (B, act_dim) and sigma.shape == (B, act_dim)
    assert jnp.allclose(value, v_ref, atol=1e-5, rtol=1e-5)
    assert jnp.allclose(mu, mu_ref, atol=1e-5, rtol=1e-5)
    assert jnp.allclose(sigma, sg_ref, atol=1e-5, rtol=1e-5)

    # TODO(synk): optional bf16 matmul-input cast for v6e/v7x (keeps f32 accum /
    # activations) would relax this 1e-5 tolerance to ~1e-3, so it is left off.

    print("KERNEL_OK")
</pallas_src>

<mosaic_0001>
module attributes {stable_mosaic.version = 11 : i64} {
  func.func @_actor_critic_kernel(%arg0: i32, %arg1: memref<1x1xf32, #tpu.memory_space<smem>>, %arg2: memref<8x8xf32, #tpu.memory_space<vmem>>, %arg3: memref<8x512xf32, #tpu.memory_space<vmem>>, %arg4: memref<1x640xf32, #tpu.memory_space<vmem>>, %arg5: memref<512x128xf32, #tpu.memory_space<vmem>>, %arg6: memref<8x128xf32, #tpu.memory_space<vmem>>) attributes {dimension_semantics = [#tpu.dimension_semantics<parallel>], iteration_bounds = array<i64: 1>, scalar_prefetch = 0 : i64, scratch_operands = 0 : i64, tpu.core_type = #tpu.core_type<tc>, window_params = [{transform_indices = @transform_0, window_bounds = array<i64: 1, 1>}, {transform_indices = @transform_1, window_bounds = array<i64: 8, 8>}, {pipeline_mode = #tpu.pipeline_mode<synchronous>, transform_indices = @transform_2, window_bounds = array<i64: 8, 512>}, {pipeline_mode = #tpu.pipeline_mode<synchronous>, transform_indices = @transform_3, window_bounds = array<i64: 1, 640>}, {pipeline_mode = #tpu.pipeline_mode<synchronous>, transform_indices = @transform_4, window_bounds = array<i64: 512, 128>}, {transform_indices = @transform_5, window_bounds = array<i64: 8, 128>}]} {
    %c0 = arith.constant 0 : index
    %c0_0 = arith.constant 0 : index
    %0 = memref.load %arg1[%c0, %c0_0] : memref<1x1xf32, #tpu.memory_space<smem>>
    %c0_1 = arith.constant 0 : index
    %c0_2 = arith.constant 0 : index
    %1 = vector.load %arg2[%c0_1, %c0_2] : memref<8x8xf32, #tpu.memory_space<vmem>>, vector<8x8xf32>
    %c0_3 = arith.constant 0 : index
    %c0_4 = arith.constant 0 : index
    %2 = vector.load %arg4[%c0_3, %c0_4] : memref<1x640xf32, #tpu.memory_space<vmem>>, vector<1x512xf32>
    %c0_5 = arith.constant 0 : index
    %c512 = arith.constant 512 : index
    %3 = vector.load %arg4[%c0_5, %c512] : memref<1x640xf32, #tpu.memory_space<vmem>>, vector<1x128xf32>
    %c0_6 = arith.constant 0 : index
    %c0_7 = arith.constant 0 : index
    %4 = vector.load %arg3[%c0_6, %c0_7] : memref<8x512xf32, #tpu.memory_space<vmem>>, vector<8x512xf32>
    %cst = arith.constant dense<0.000000e+00> : vector<8x512xf32>
    %5 = tpu.matmul %1, %4, %cst {dimension_numbers = #tpu.dot_dimension_numbers<[1], [0], [0], [1], [0, 0, 1, 1], [], []>} : vector<8x8xf32>, vector<8x512xf32>, vector<8x512xf32> -> vector<8x512xf32>
    %6 = vector.broadcast %2 : vector<1x512xf32> to vector<8x512xf32>
    %7 = arith.addf %5, %6 : vector<8x512xf32>
    %cst_8 = arith.constant 0.000000e+00 : f32
    %cst_9 = arith.constant 6.000000e+00 : f32
    %8 = vector.broadcast %cst_8 : f32 to vector<8x512xf32>
    %9 = arith.maximumf %8, %7 : vector<8x512xf32>
    %10 = vector.broadcast %cst_9 : f32 to vector<8x512xf32>
    %11 = arith.minimumf %10, %9 : vector<8x512xf32>
    %c0_10 = arith.constant 0 : index
    %c0_11 = arith.constant 0 : index
    %12 = vector.load %arg5[%c0_10, %c0_11] : memref<512x128xf32, #tpu.memory_space<vmem>>, vector<512x128xf32>
    %cst_12 = arith.constant dense<0.000000e+00> : vector<8x128xf32>
    %13 = tpu.matmul %11, %12, %cst_12 {dimension_numbers = #tpu.dot_dimension_numbers<[1], [0], [0], [1], [0, 0, 1, 1], [], []>} : vector<8x512xf32>, vector<512x128xf32>, vector<8x128xf32> -> vector<8x128xf32>
    %14 = vector.broadcast %3 : vector<1x128xf32> to vector<8x128xf32>
    %15 = arith.addf %13, %14 : vector<8x128xf32>
    %16 = tpu.iota {dimensions = array<i32: 1>} : vector<8x128xi32>
    %17 = math.tanh %15 : vector<8x128xf32>
    %18 = vector.broadcast %0 : f32 to vector<8x128xf32>
    %19 = arith.mulf %17, %18 : vector<8x128xf32>
    %cst_13 = arith.constant 0.000000e+00 : f32
    %20 = vector.broadcast %cst_13 : f32 to vector<8x128xf32>
    %21 = arith.maximumf %15, %20 : vector<8x128xf32>
    %22 = math.absf %15 : vector<8x128xf32>
    %cst_14 = arith.constant 0.000000e+00 : f32
    %23 = vector.broadcast %cst_14 : f32 to vector<8x128xf32>
    %24 = arith.subf %23, %22 : vector<8x128xf32>
    %25 = math.exp %24 : vector<8x128xf32>
    %26 = math.log1p %25 : vector<8x128xf32>
    %27 = arith.addf %21, %26 : vector<8x128xf32>
    %c0_i32 = arith.constant 0 : i32
    %28 = vector.broadcast %c0_i32 : i32 to vector<8x128xi32>
    %29 = arith.cmpi eq, %16, %28 : vector<8x128xi32>
    %c4_i32 = arith.constant 4 : i32
    %30 = vector.broadcast %c4_i32 : i32 to vector<8x128xi32>
    %31 = arith.cmpi sle, %16, %30 : vector<8x128xi32>
    %c8_i32 = arith.constant 8 : i32
    %32 = vector.broadcast %c8_i32 : i32 to vector<8x128xi32>
    %33 = arith.cmpi sle, %16, %32 : vector<8x128xi32>
    %cst_15 = arith.constant 0.000000e+00 : f32
    %34 = vector.broadcast %cst_15 : f32 to vector<8x128xf32>
    %35 = arith.select %33, %27, %34 : vector<8x128xi1>, vector<8x128xf32>
    %36 = arith.select %31, %19, %35 : vector<8x128xi1>, vector<8x128xf32>
    %37 = arith.select %29, %15, %36 : vector<8x128xi1>, vector<8x128xf32>
    %c0_16 = arith.constant 0 : index
    %c0_17 = arith.constant 0 : index
    %38 = vector.load %arg6[%c0_16, %c0_17] : memref<8x128xf32, #tpu.memory_space<vmem>>, vector<8x128xf32>
    tpu.vector_store %arg6[%c0_16, %c0_17], %37 {strides = array<i32>} : memref<8x128xf32, #tpu.memory_space<vmem>>, vector<8x128xf32>,
    return
  }
  func.func @transform_0(%arg0: i32) -> (i32, i32) {
    %c0_i32 = arith.constant 0 : i32
    %c0_i32_0 = arith.constant 0 : i32
    %c0_i32_1 = arith.constant 0 : i32
    return %c0_i32, %c0_i32_0 : i32, i32
  }
  func.func @transform_1(%arg0: i32) -> (i32, i32) {
    %c0_i32 = arith.constant 0 : i32
    %c0_i32_0 = arith.constant 0 : i32
    return %arg0, %c0_i32 : i32, i32
  }
  func.func @transform_2(%arg0: i32) -> (i32, i32) {
    %c0_i32 = arith.constant 0 : i32
    %c0_i32_0 = arith.constant 0 : i32
    %c0_i32_1 = arith.constant 0 : i32
    return %c0_i32, %c0_i32_0 : i32, i32
  }
  func.func @transform_3(%arg0: i32) -> (i32, i32) {
    %c0_i32 = arith.constant 0 : i32
    %c0_i32_0 = arith.constant 0 : i32
    %c0_i32_1 = arith.constant 0 : i32
    return %c0_i32, %c0_i32_0 : i32, i32
  }
  func.func @transform_4(%arg0: i32) -> (i32, i32) {
    %c0_i32 = arith.constant 0 : i32
    %c0_i32_0 = arith.constant 0 : i32
    %c0_i32_1 = arith.constant 0 : i32
    return %c0_i32, %c0_i32_0 : i32, i32
  }
  func.func @transform_5(%arg0: i32) -> (i32, i32) {
    %c0_i32 = arith.constant 0 : i32
    %c0_i32_0 = arith.constant 0 : i32
    return %arg0, %c0_i32 : i32, i32
  }
}

</mosaic_0001>

<bundles_post_ra>
// kernel: tpu_custom_call.1
= control target key start
LH: loop header
LB: loop body
LE: loop exit
PB: predicated region body
PF: predicated region fallthrough
CT: control target
= control target key end

     0   :  { %11 = vsyncpa [#allocation4], 0  ;;  %s725_s0 = inlined_call_operand.<no memory space> [shape: f32[1,1], index: 0, kind: input, shape index: {}]   ;;  %s726_s1 = inlined_call_operand.hbm [shape: f32[8,8], index: 1, kind: input, shape index: {}]   ;;  %s727_s2 = inlined_call_operand.hbm [shape: f32[8,512], index: 2, kind: input, shape index: {}]   ;;  %s728_s3 = inlined_call_operand.vmem [shape: f32[1,640], index: 3, kind: input, shape index: {}]   ;;  %s729_s4 = inlined_call_operand.hbm [shape: f32[512,128], index: 4, kind: input, shape index: {}]   ;;  %s730_s5 = inlined_call_operand.hbm [shape: f32[8,128], index: 5, kind: output, shape index: {}]  }
   0x1   :  { %12 = vsyncpa [#allocation7], 0 }
   0x2   :  { %13 = vsyncpa [#allocation5], 0  ;;  %s667_s18 = smov [#allocation6]   ;;  %s668_s20 = smov [#allocation3]  }
   0x3   :  { %s32_s19 = sshll.u32 %s667_s18, 4  ;;  %s22_s21 = sshll.u32 %s668_s20, 4  ;;  %s33_s19 = int_to_ptr.vmem [resolvable:$true] %s32_s19  ;;  %s23_s21 = int_to_ptr.vmem [resolvable:$true] %s22_s21 }
   0x4   :  { %s589_s22 = scalar_lea.vmem %s33_s19, 512  ;;  %p594_p1 = scmp.lt.s32.totalorder %s33_s19, %s33_s19 }
   0x5   :  { %p590_p0 = scmp.ne.s32.totalorder %s33_s19, %s589_s22  ;;  %p595_p2 = scmp.lt.s32.totalorder %s589_s22, %s589_s22 }
   0x7   :  { %p596_p3 = por %p595_p2, %p594_p1 }
   0x9   :  { %p597_p4 = pnand %p596_p3, %p590_p0 }
   0xb   :  { %600 = shalt.err (!%p597_p4)
}
   0xc   :  { %35 = dma.hbm_to_vmem [thread:$0]  %s727_s2, 512, %s33_s19, [#allocation7]  }
   0xd   :  { %s609_s25 = scalar_lea.vmem %s23_s21, 128  ;;  %p614_p6 = scmp.lt.s32.totalorder %s23_s21, %s23_s21 }
   0xe   :  { %p610_p5 = scmp.ne.s32.totalorder %s23_s21, %s609_s25  ;;  %p615_p7 = scmp.lt.s32.totalorder %s609_s25, %s609_s25 }
  0x10   :  { %p616_p8 = por %p615_p7, %p614_p6 }
  0x12   :  { %p617_p9 = pnand %p616_p8, %p610_p5 }
  0x14   :  { %620 = shalt.err (!%p617_p9)
}
  0x15   :  { %25 = dma.hbm_to_vmem [thread:$0]  %s726_s1, 128, %s23_s21, [#allocation4]  }
  0x16   :  { %s669_s28 = smov [#allocation8]  }
  0x17   :  { %s43_s29 = sshll.u32 %s669_s28, 4  ;;  %s44_s29 = int_to_ptr.vmem [resolvable:$true] %s43_s29 }
  0x18   :  { %s629_s30 = scalar_lea.vmem %s44_s29, 8192  ;;  %p634_p11 = scmp.lt.s32.totalorder %s44_s29, %s44_s29 }
  0x19   :  { %p630_p10 = scmp.ne.s32.totalorder %s44_s29, %s629_s30  ;;  %p635_p12 = scmp.lt.s32.totalorder %s629_s30, %s629_s30 }
  0x1b   :  { %p636_p13 = por %p635_p12, %p634_p11 }
  0x1d   :  { %p637_p0 = pnand %p636_p13, %p630_p10 }
  0x1f   :  { %640 = shalt.err (!%p637_p0)
}
  0x20   :  { %s670_s2 = smov 128   ;;  %s671_s6 = smov 8  }
  0x21   :  { %49 = dma.hbm_to_vmem [thread:$0]  %s729_s4, 8192, %s44_s29, [#allocation7], %s670_s2, %s670_s2, %s671_s6  }
  0x22   :  { %661 = dma.done.wait [#allocation4], 128  }
  0x23   :  { %662 = vsyncadd [#allocation4], 4294967168 }
  0x24   :  { %663 = dma.done.wait [#allocation7], 8704  }
  0x25   :  { %664 = vsyncadd [#allocation7], 4294958592  ;;  %v672_v0 = vmov 0.0   ;;  %v64_v1 = vld [vmem:[#allocation6 + $0x8] sm:$0xff]  ;;  %v66_v2 = vld [vmem:[#allocation6 + $0x18] sm:$0xff]  ;;  %vm88_vm0 = vcmask 64512  }
  0x26   :  { %156 = vmatprep.mubr.f32.mxu0 %v672_v0  ;;  %227 = vmatprep.mubr.f32.mxu1 %v672_v0  ;;  %v63_v3 = vld [vmem:[#allocation6] sm:$0xff]  ;;  %v65_v4 = vld [vmem:[#allocation6 + $0x10] sm:$0xff]  ;;  %v60_v5 = vld [vmem:[#allocation3] sm:$0xff]  ;;  %s673_s12 = smov [#allocation9]  }
  0x27   :  { %122 = vmatprep.subr.mxu0 %v64_v1  ;;  %193 = vmatprep.subr.mxu1 %v66_v2  ;;  %v273_v6 = vld [vmem:[#allocation8 + $0xf8] sm:$0xff]  ;;  %v272_v10 = vld [vmem:[#allocation8 + $0xf0] sm:$0xff]  ;;  %v271_v14 = vld [vmem:[#allocation8 + $0xe8] sm:$0xff]  ;;  %s485_s13 = sshll.u32 %s673_s12, 4  ;;  %s486_s13 = int_to_ptr.vmem [resolvable:$true] %s485_s13 }
  0x28   :  { %123 = vmatpush1.msra.mxu0 %v63_v3  ;;  %194 = vmatpush1.msra.mxu1 %v65_v4  ;;  %v305_v7 = vld [vmem:[#allocation8 + $0x1f8] sm:$0xff]  ;;  %v304_v11 = vld [vmem:[#allocation8 + $0x1f0] sm:$0xff]  ;;  %v303_v15 = vld [vmem:[#allocation8 + $0x1e8] sm:$0xff]  ;;  %s641_s14 = scalar_lea.vmem %s486_s13, 128  ;;  %p646_p2 = scmp.lt.s32.totalorder %s486_s13, %s486_s13 }
  0x29   :  { %v257_v8 = vld [vmem:[#allocation8 + $0x78] sm:$0xff]  ;;  %495 = vmatmul.mubr.msk.f32.vlgmr.msra.gmra.mxu0 %vm88_vm0, %v60_v5  ;;  %496 = vmatmul.mubr.msk.f32.vlgmr.msra.gmra.mxu1 %vm88_vm0, %v60_v5  ;;  %v256_v12 = vld [vmem:[#allocation8 + $0x70] sm:$0xff]  ;;  %v255_v16 = vld [vmem:[#allocation8 + $0x68] sm:$0xff]  ;;  %p642_p1 = scmp.ne.s32.totalorder %s486_s13, %s641_s14  ;;  %p647_p3 = scmp.lt.s32.totalorder %s641_s14, %s641_s14 }
  0x2a   :  { %v289_v9 = vld [vmem:[#allocation8 + $0x178] sm:$0xff]  ;;  %498 = vmatprep.subr.mxu0 %v273_v6  ;;  %533 = vmatprep.subr.mxu1 %v305_v7  ;;  %v288_v13 = vld [vmem:[#allocation8 + $0x170] sm:$0xff]  ;;  %v287_v17 = vld [vmem:[#allocation8 + $0x168] sm:$0xff]  ;;  %v68_v6 = vlaneseq }
  0x2b   :  { %499 = vmatpush3.msra.mxu0 %v257_v8  ;;  %534 = vmatpush3.msra.mxu1 %v289_v9  ;;  %v270_v18 = vld [vmem:[#allocation8 + $0xe0] sm:$0xff]  ;;  %v269_v22 = vld [vmem:[#allocation8 + $0xd8] sm:$0xff]  ;;  %v268_v26 = vld [vmem:[#allocation8 + $0xd0] sm:$0xff]  ;;  %p648_p4 = por %p647_p3, %p646_p2 }
  0x2c   :  { %500 = vmatprep.subr.mxu0 %v272_v10  ;;  %535 = vmatprep.subr.mxu1 %v304_v11  ;;  %v302_v19 = vld [vmem:[#allocation8 + $0x1e0] sm:$0xff]  ;;  %v301_v23 = vld [vmem:[#allocation8 + $0x1d8] sm:$0xff]  ;;  %v300_v27 = vld [vmem:[#allocation8 + $0x1d0] sm:$0xff]  ;;  %v69_v7 = vshrl.u32 %v68_v6, 7 }
  0x2d   :  { %501 = vmatpush3.msra.mxu0 %v256_v12  ;;  %536 = vmatpush3.msra.mxu1 %v288_v13  ;;  %v254_v20 = vld [vmem:[#allocation8 + $0x60] sm:$0xff]  ;;  %v253_v24 = vld [vmem:[#allocation8 + $0x58] sm:$0xff]  ;;  %v252_v28 = vld [vmem:[#allocation8 + $0x50] sm:$0xff]  ;;  %p649_p5 = pnand %p648_p4, %p642_p1 }
  0x2e   :  { %502 = vmatprep.subr.mxu0 %v271_v14  ;;  %537 = vmatprep.subr.mxu1 %v303_v15  ;;  %v286_v21 = vld [vmem:[#allocation8 + $0x160] sm:$0xff]  ;;  %v285_v25 = vld [vmem:[#allocation8 + $0x158] sm:$0xff]  ;;  %v284_v29 = vld [vmem:[#allocation8 + $0x150] sm:$0xff]  ;;  %v70_v8 = vsub.s32 0, %v69_v7  ;;  %v78_v9 = vsub.s32 2, %v69_v7  ;;  %v74_v11 = vsub.s32 1, %v69_v7 }
  0x2f   :  { %503 = vmatpush3.msra.mxu0 %v255_v16  ;;  %538 = vmatpush3.msra.mxu1 %v287_v17  ;;  %v267_v30 = vld [vmem:[#allocation8 + $0xc8] sm:$0xff]  ;;  %v266_v34 = vld [vmem:[#allocation8 + $0xc0] sm:$0xff]  ;;  %v265_v38 = vld [vmem:[#allocation8 + $0xb8] sm:$0xff]  ;;  %v82_v12 = vsub.s32 3, %v69_v7 }
  0x30   :  { %504 = vmatprep.subr.mxu0 %v270_v18  ;;  %539 = vmatprep.subr.mxu1 %v302_v19  ;;  %v299_v31 = vld [vmem:[#allocation8 + $0x1c8] sm:$0xff]  ;;  %v298_v35 = vld [vmem:[#allocation8 + $0x1c0] sm:$0xff]  ;;  %v297_v39 = vld [vmem:[#allocation8 + $0x1b8] sm:$0xff] }
  0x31   :  { %505 = vmatpush3.msra.mxu0 %v254_v20  ;;  %540 = vmatpush3.msra.mxu1 %v286_v21  ;;  %v251_v32 = vld [vmem:[#allocation8 + $0x48] sm:$0xff]  ;;  %v250_v36 = vld [vmem:[#allocation8 + $0x40] sm:$0xff]  ;;  %v249_v40 = vld [vmem:[#allocation8 + $0x38] sm:$0xff] }
  0x32   :  { %506 = vmatprep.subr.mxu0 %v269_v22  ;;  %541 = vmatprep.subr.mxu1 %v301_v23  ;;  %v283_v33 = vld [vmem:[#allocation8 + $0x148] sm:$0xff]  ;;  %v282_v37 = vld [vmem:[#allocation8 + $0x140] sm:$0xff]  ;;  %v281_v41 = vld [vmem:[#allocation8 + $0x138] sm:$0xff] }
  0x33   :  { %507 = vmatpush3.msra.mxu0 %v253_v24  ;;  %542 = vmatpush3.msra.mxu1 %v285_v25  ;;  %v264_v42 = vld [vmem:[#allocation8 + $0xb0] sm:$0xff]  ;;  %v263_v46 = vld [vmem:[#allocation8 + $0xa8] sm:$0xff]  ;;  %v262_v50 = vld [vmem:[#allocation8 + $0xa0] sm:$0xff] }
  0x34   :  { %508 = vmatprep.subr.mxu0 %v268_v26  ;;  %543 = vmatprep.subr.mxu1 %v300_v27  ;;  %v296_v43 = vld [vmem:[#allocation8 + $0x1b0] sm:$0xff]  ;;  %v295_v47 = vld [vmem:[#allocation8 + $0x1a8] sm:$0xff]  ;;  %v294_v51 = vld [vmem:[#allocation8 + $0x1a0] sm:$0xff] }
  0x35   :  { %509 = vmatpush3.msra.mxu0 %v252_v28  ;;  %544 = vmatpush3.msra.mxu1 %v284_v29  ;;  %v248_v44 = vld [vmem:[#allocation8 + $0x30] sm:$0xff]  ;;  %v247_v48 = vld [vmem:[#allocation8 + $0x28] sm:$0xff]  ;;  %v246_v52 = vld [vmem:[#allocation8 + $0x20] sm:$0xff] }
  0x36   :  { %510 = vmatprep.subr.mxu0 %v267_v30  ;;  %545 = vmatprep.subr.mxu1 %v299_v31  ;;  %v280_v45 = vld [vmem:[#allocation8 + $0x130] sm:$0xff]  ;;  %v279_v49 = vld [vmem:[#allocation8 + $0x128] sm:$0xff]  ;;  %v278_v53 = vld [vmem:[#allocation8 + $0x120] sm:$0xff] }
  0x37   :  { %511 = vmatpush3.msra.mxu0 %v251_v32  ;;  %546 = vmatpush3.msra.mxu1 %v283_v33  ;;  %v261_v54 = vld [vmem:[#allocation8 + $0x98] sm:$0xff]  ;;  %v260_v58 = vld [vmem:[#allocation8 + $0x90] sm:$0xff]  ;;  %v259_v62 = vld [vmem:[#allocation8 + $0x88] sm:$0xff] }
  0x38   :  { %512 = vmatprep.subr.mxu0 %v266_v34  ;;  %547 = vmatprep.subr.mxu1 %v298_v35  ;;  %v293_v55 = vld [vmem:[#allocation8 + $0x198] sm:$0xff]  ;;  %v292_v59 = vld [vmem:[#allocation8 + $0x190] sm:$0xff]  ;;  %v291_v63 = vld [vmem:[#allocation8 + $0x188] sm:$0xff] }
  0x39   :  { %513 = vmatpush3.msra.mxu0 %v250_v36  ;;  %548 = vmatpush3.msra.mxu1 %v282_v37  ;;  %v245_v56 = vld [vmem:[#allocation8 + $0x18] sm:$0xff]  ;;  %v244_v60 = vld [vmem:[#allocation8 + $0x10] sm:$0xff]  ;;  %v243_v0 = vld [vmem:[#allocation8 + $0x8] sm:$0xff] }
  0x3a   :  { %514 = vmatprep.subr.mxu0 %v265_v38  ;;  %549 = vmatprep.subr.mxu1 %v297_v39  ;;  %v277_v57 = vld [vmem:[#allocation8 + $0x118] sm:$0xff]  ;;  %v276_v61 = vld [vmem:[#allocation8 + $0x110] sm:$0xff]  ;;  %v275_v1 = vld [vmem:[#allocation8 + $0x108] sm:$0xff] }
  0x3b   :  { %515 = vmatpush3.msra.mxu0 %v249_v40  ;;  %550 = vmatpush3.msra.mxu1 %v281_v41  ;;  %v258_v2 = vld [vmem:[#allocation8 + $0x80] sm:$0xff]  ;;  %v61_v10 = vld [vmem:[%s728_s3] sm:$0xf]  ;;  %v497_v35 = vld [vmem:[%s728_s3 + $0x4] ss:$0 sm:$0xff] }
  0x3c   :  { %516 = vmatprep.subr.mxu0 %v264_v42  ;;  %551 = vmatprep.subr.mxu1 %v296_v43  ;;  %v290_v3 = vld [vmem:[#allocation8 + $0x180] sm:$0xff]  ;;  %v71_v13 = vrot.slane %v61_v10, %v70_v8  ;;  %v79_v14 = vrot.slane %v61_v10, %v78_v9  ;;  %v75_v15 = vrot.slane %v61_v10, %v74_v11 }
  0x3d   :  { %517 = vmatpush3.msra.mxu0 %v248_v44  ;;  %552 = vmatpush3.msra.mxu1 %v280_v45  ;;  %v242_v4 = vld [vmem:[#allocation8] sm:$0xff]  ;;  %v83_v16 = vrot.slane %v61_v10, %v82_v12 }
  0x3e   :  { %518 = vmatprep.subr.mxu0 %v263_v46  ;;  %553 = vmatprep.subr.mxu1 %v295_v47  ;;  %v274_v5 = vld [vmem:[#allocation8 + $0x100] sm:$0xff] }
  0x3f   :  { %519 = vmatpush3.msra.mxu0 %v247_v48  ;;  %554 = vmatpush3.msra.mxu1 %v279_v49 }
  0x40   :  { %520 = vmatprep.subr.mxu0 %v262_v50  ;;  %555 = vmatprep.subr.mxu1 %v294_v51  ;;  %v453_v50 = vand.u32 127, %v68_v6 }
  0x41   :  { %521 = vmatpush3.msra.mxu0 %v246_v52  ;;  %556 = vmatpush3.msra.mxu1 %v278_v53 }
  0x42   :  { %522 = vmatprep.subr.mxu0 %v261_v54  ;;  %557 = vmatprep.subr.mxu1 %v293_v55  ;;  %vm474_vm2 = vcmp.le.s32.totalorder %v453_v50, 8  ;;  %vm473_vm3 = vcmp.le.s32.totalorder %v453_v50, 4  ;;  %vm472_vm4 = vcmp.eq.s32.totalorder %v453_v50, 0 }
  0x43   :  { %523 = vmatpush3.msra.mxu0 %v245_v56  ;;  %558 = vmatpush3.msra.mxu1 %v277_v57  ;;  %v455_v56 = vstv %s725_s0 }
  0x44   :  { %524 = vmatprep.subr.mxu0 %v260_v58  ;;  %559 = vmatprep.subr.mxu1 %v292_v59 }
  0x45   :  { %525 = vmatpush3.msra.mxu0 %v244_v60  ;;  %560 = vmatpush3.msra.mxu1 %v276_v61 }
  0x46   :  { %526 = vmatprep.subr.mxu0 %v259_v62  ;;  %561 = vmatprep.subr.mxu1 %v291_v63 }
  0x47   :  { %527 = vmatpush3.msra.mxu0 %v243_v0  ;;  %562 = vmatpush3.msra.mxu1 %v275_v1 }
  0x48   :  { %528 = vmatprep.subr.mxu0 %v258_v2  ;;  %563 = vmatprep.subr.mxu1 %v290_v3 }
  0x49   :  { %529 = vmatpush3.msra.mxu0 %v242_v4  ;;  %564 = vmatpush3.msra.mxu1 %v274_v5 }
  0xe9   :  { %v158_v17 = vpop.f32.mrf.mxu0  ;;  %v229_v18 = vpop.f32.mrf.mxu1 }
  0xea   :  { %v159_v19 = vadd.f32 %v158_v17, %v71_v13  ;;  %v230_v20 = vadd.f32 %v229_v18, %v79_v14 }
  0xeb   :  { %v160_v21 = vpop.f32.mrf.mxu0  ;;  %v231_v22 = vpop.f32.mrf.mxu1 }
  0xec   :  { %v236_v23 = vmax.f32 %v230_v20, 0.0  ;;  %v161_v24 = vadd.f32 %v160_v21, %v75_v15  ;;  %v232_v25 = vadd.f32 %v231_v22, %v83_v16  ;;  %v234_v26 = vmax.f32 %v159_v19, 0.0 }
  0xee   :  { %v235_v27 = vmax.f32 %v161_v24, 0.0  ;;  %v237_v28 = vmax.f32 %v232_v25, 0.0  ;;  %v240_v29 = vmin.f32 %v236_v23, 6.0  ;;  %v238_v32 = vmin.f32 %v234_v26, 6.0 }
  0xf0   :  { %v239_v30 = vmin.f32 %v235_v27, 6.0  ;;  %v241_v31 = vmin.f32 %v237_v28, 6.0 }
  0xf2   :  { %376 = vmatprep.mubr.f32.mxu0 %v239_v30  ;;  %446 = vmatprep.mubr.f32.mxu1 %v241_v31 }
  0xf3   :  { %377 = vmatmul.mubr.f32.vlgmr.msra.gmra.mxu0 %v238_v32  ;;  %447 = vmatmul.mubr.f32.vlgmr.msra.gmra.mxu1 %v240_v29 }
 0x1b3   :  { %v530_v33 = vpop.f32.mrf.mxu0  ;;  %v565_v34 = vpop.f32.mrf.mxu1 }
 0x1b5   :  { %v531_v36 = vpop.f32.mrf.mxu0  ;;  %v566_v37 = vpop.f32.mrf.mxu1 }
 0x1b6   :  { %v532_v38 = vadd.f32 %v531_v36, %v530_v33  ;;  %v567_v40 = vadd.f32 %v566_v37, %v565_v34 }
 0x1b8   :  { %v379_v39 = vadd.f32 %v532_v38, %v497_v35 }
 0x1ba   :  { %v449_v41 = vadd.f32 %v567_v40, %v379_v39 }
 0x1bc   :  { %v458_v42 = vand.u32 2147483647, %v449_v41  ;;  %v457_v55 = vmax.f32 %v449_v41, 0.0 }
 0x1be   :  { %v459_v43 = vsub.f32 0.0, %v458_v42 }
 0x1c0   :  { %v460_v44 = vmul.f32 1.442695, %v459_v43 }
 0x1c2   :  { %575 = vpow2.f32 %v460_v44 }
 0x1cf   :  { %v576_v45 = vpop.eup %575 }
 0x1d0   :  { %v462_v46 = vadd.f32 1.0, %v576_v45  ;;  %v465_v47 = vmul.f32 -0.5, %v576_v45  ;;  %v468_v49 = vand.u32 2147483647, %v576_v45 }
 0x1d2   :  { %577 = vlog2.f32 %v462_v46  ;;  %v466_v48 = vadd.f32 1.0, %v465_v47  ;;  %vm469_vm1 = vcmp.lt.f32.partialorder %v468_v49, 0.0004427343 }
 0x1d3   :  { %579 = vtanh.f32 %v449_v41 }
 0x1d4   :  { %v467_v53 = vmul.f32 %v576_v45, %v466_v48 }
 0x1df   :  { %v578_v51 = vpop.eup %577 }
 0x1e0   :  { %v464_v52 = vmul.f32 0.6931472, %v578_v51  ;;  %v580_v54 = vpop.eup %579 }
 0x1e1   :  { %v456_v59 = vmul.f32 %v580_v54, %v455_v56 }
 0x1e2   :  { %v470_v57 = vsel %vm469_vm1, %v467_v53, %v464_v52 }
 0x1e3   :  { %v471_v58 = vadd.f32 %v470_v57, %v457_v55 }
 0x1e5   :  { %v475_v60 = vsel %vm474_vm2, %v471_v58, 0.0 }
 0x1e6   :  { %v476_v61 = vsel %vm473_vm3, %v456_v59, %v475_v60 }
 0x1e7   :  { %v477_v62 = vsel %vm472_vm4, %v449_v41, %v476_v61 }
 0x1e8   :  { %478 = vst [vmem:[#allocation9] sm:$0xff] %v477_v62 }
 0x1e9   :  { %652 = shalt.err (!%p649_p5)
}
 0x1ea   :  { %488 = dma.vmem_to_hbm [thread:$0]  %s486_s13, 128, %s730_s5, [#allocation5]  }
 0x1eb   :  { %665 = dma.done.wait [#allocation5], 128  }
 0x1ec   :  { %666 = vsyncadd [#allocation5], 4294967168 }
 0x1ed   :  { %492 = vsyncpa [#allocation4], 1 }
 0x1ee   :  { %493 = vsyncpa [#allocation7], 1 }
 0x1ef   :  { %494 = vsyncpa [#allocation5], 1 }

</bundles_post_ra>
